<compile_context>
chip_gen: v6e
topology: v6e:2x2x1
jax: 0.10.0
libtpu: 0.0.40
codegen_flags: <defaults>
</compile_context>

<pallas_src>
import jax
import jax.numpy as jnp
from jax import lax
from jax.experimental import pallas as pl
from jax.experimental.pallas import tpu as pltpu


def _round_up(x: int, m: int) -> int:
    return (x + m - 1) // m * m


# ----------------------------------------------------------------- stage 1 ---
def _prep_kernel(a_ref, x_ref, w_ref, b_ref,          # inputs
                 h_ref, c_ref, dinv_ref,               # outputs
                 deg_acc, diag_acc):                   # scratch
    i = pl.program_id(0)
    k = pl.program_id(1)

    @pl.when(k == 0)
    def _init():
        deg_acc[...] = jnp.zeros_like(deg_acc)
        diag_acc[...] = jnp.zeros_like(diag_acc)

    a = a_ref[...]                                     # (TM, TM) tile of A
    # Partial row-sum of A over this column tile (XLU reduce, hides under DMA).
    deg_acc[...] += jnp.sum(a, axis=1, keepdims=True)

    # The diagonal of A crosses this row tile only when k == i (square tiles).
    @pl.when(k == i)
    def _grab_diag():
        tm = a.shape[0]
        rr = lax.broadcasted_iota(jnp.int32, (tm, tm), 0)
        cc = lax.broadcasted_iota(jnp.int32, (tm, tm), 1)
        diag_acc[...] = jnp.sum(jnp.where(rr == cc, a, 0.0),
                                axis=1, keepdims=True)

    @pl.when(k == pl.num_programs(1) - 1)
    def _finalize():
        # degree with self-loops: rowsum(A) - diag(A) + 1
        deg = deg_acc[...] - diag_acc[...] + 1.0
        dinv = lax.rsqrt(deg)                                          # (TM, 1)
        xw = jnp.dot(x_ref[...], w_ref[...],
                     preferred_element_type=jnp.float32) + b_ref[...]  # (TM, DP)
        h = dinv * xw
        h_ref[...] = h.astype(h_ref.dtype)
        # self-loop correction, pre-scaled by the left dinv: c_i = dinv_i*(1-A_ii)*h_i
        c_ref[...] = (dinv * (1.0 - diag_acc[...]) * h).astype(c_ref.dtype)
        dinv_ref[...] = dinv.astype(dinv_ref.dtype)


# ----------------------------------------------------------------- stage 2 ---
def _spmm_kernel(a_ref, h_ref, c_ref, dinv_ref, o_ref, acc_ref):
    k = pl.program_id(1)

    @pl.when(k == 0)
    def _init():
        acc_ref[...] = jnp.zeros_like(acc_ref)

    acc_ref[...] += jnp.dot(a_ref[...], h_ref[...],
                            preferred_element_type=jnp.float32)

    @pl.when(k == pl.num_programs(1) - 1)
    def _finalize():
        o_ref[...] = (dinv_ref[...] * acc_ref[...] + c_ref[...]).astype(o_ref.dtype)


def gcn_conv(A, x, weight, bias, *, tile_n: int = 256):
    """out = D^{-1/2} (A with unit diagonal) D^{-1/2} (x @ weight + bias)."""
    n = A.shape[0]
    d_in = x.shape[1]
    d_out = weight.shape[1]

    # Lane-dense feature dim (full-width 128-lane stores / MXU N dimension).
    DP = _round_up(d_out, 128)
    # Square, 8-aligned (row, k) tiles over A; pad n up to a tile multiple.
    TM = min(_round_up(tile_n, 8), _round_up(n, 8))
    NP = _round_up(n, TM)

    f32 = jnp.float32
    # Zero padding is exact: padded columns of A contribute nothing to real rows,
    # padded rows get deg = 1 (no NaN) and are sliced off at the end.
    A_p = jnp.zeros((NP, NP), f32).at[:n, :n].set(A.astype(f32))
    x_p = jnp.zeros((NP, d_in), f32).at[:n, :].set(x.astype(f32))
    w_p = jnp.zeros((d_in, DP), f32).at[:, :d_out].set(weight.astype(f32))
    b_p = jnp.zeros((1, DP), f32).at[0, :d_out].set(bias.astype(f32))

    grid = (NP // TM, NP // TM)
    cparams = pltpu.CompilerParams(
        dimension_semantics=("parallel", "arbitrary"),
        vmem_limit_bytes=32 * 1024 * 1024,
    )

    # Stage 1: degrees + linear transform (tiled over row tiles / column tiles).
    h, c, dinv = pl.pallas_call(
        _prep_kernel,
        out_shape=(
            jax.ShapeDtypeStruct((NP, DP), f32),   # h    = dinv * (x @ W + b)
            jax.ShapeDtypeStruct((NP, DP), f32),   # c    = dinv * (1 - diag(A)) * h
            jax.ShapeDtypeStruct((NP, 1), f32),    # dinv
        ),
        grid_spec=pltpu.PrefetchScalarGridSpec(
            num_scalar_prefetch=0,
            grid=grid,
            in_specs=[
                pl.BlockSpec((TM, TM), lambda i, k: (i, k)),    # A tile
                pl.BlockSpec((TM, d_in), lambda i, k: (i, 0)),  # x rows (resident/i)
                pl.BlockSpec((d_in, DP), lambda i, k: (0, 0)),  # W (resident)
                pl.BlockSpec((1, DP), lambda i, k: (0, 0)),     # b (resident)
            ],
            out_specs=(
                pl.BlockSpec((TM, DP), lambda i, k: (i, 0)),
                pl.BlockSpec((TM, DP), lambda i, k: (i, 0)),
                pl.BlockSpec((TM, 1), lambda i, k: (i, 0)),
            ),
            scratch_shapes=[
                pltpu.VMEM((TM, 1), f32),   # partial row sums of A
                pltpu.VMEM((TM, 1), f32),   # diag(A) for this row tile
            ],
        ),
        compiler_params=cparams,
    )(A_p, x_p, w_p, b_p)

    # Stage 2: tiled A @ h with an f32 accumulator; scale by dinv and add the
    # self-loop correction at the last reduction step.
    out_p = pl.pallas_call(
        _spmm_kernel,
        out_shape=jax.ShapeDtypeStruct((NP, DP), f32),
        grid_spec=pltpu.PrefetchScalarGridSpec(
            num_scalar_prefetch=0,
            grid=grid,
            in_specs=[
                pl.BlockSpec((TM, TM), lambda i, k: (i, k)),   # A tile
                pl.BlockSpec((TM, DP), lambda i, k: (k, 0)),   # h rows for this k
                pl.BlockSpec((TM, DP), lambda i, k: (i, 0)),   # c rows (resident/i)
                pl.BlockSpec((TM, 1), lambda i, k: (i, 0)),    # dinv (resident/i)
            ],
            out_specs=pl.BlockSpec((TM, DP), lambda i, k: (i, 0)),
            scratch_shapes=[pltpu.VMEM((TM, DP), f32)],        # f32 accumulator
        ),
        compiler_params=cparams,
    )(A_p, h, c, dinv)

    return out_p[:n, :d_out]


# --------------------------------------------------------------- reference ---
def gcn_ref(A, x, weight, bias):
    xw = x @ weight + bias
    n = A.shape[0]
    a1 = A.at[jnp.arange(n), jnp.arange(n)].set(1.0)
    dinv = jnp.sum(a1, axis=1) ** -0.5
    an = dinv[:, None] * a1 * dinv[None, :]
    return an @ xw


if __name__ == "__main__":
    key = jax.random.PRNGKey(0)

    def run_case(n, d_in, d_out, density, kk):
        k_a, k_x, k_w, k_b = jax.random.split(kk, 4)
        A = (jax.random.uniform(k_a, (n, n)) > (1.0 - density)).astype(jnp.float32)
        x = jax.random.normal(k_x, (n, d_in), dtype=jnp.float32)
        weight = jax.random.normal(k_w, (d_in, d_out), dtype=jnp.float32) * 0.1
        bias = jax.random.normal(k_b, (d_out,), dtype=jnp.float32) * 0.1

        out = jax.block_until_ready(gcn_conv(A, x, weight, bias))
        ref = gcn_ref(A, x, weight, bias)
        assert out.shape == (n, d_out)
        assert jnp.allclose(out, ref, atol=1e-4, rtol=1e-4), f"mismatch (n={n})"

    k1, k2 = jax.random.split(key)
    # Tiny case, matches the module's typical sizes (single-tile grid).
    run_case(16, 32, 32, 0.3, k1)
    # Multi-tile case: exercises the k-reduction accumulator, diag-crossing tiles,
    # and row/col/lane padding (n=300 -> 512, d_out=40 -> 128).
    run_case(300, 48, 40, 0.3, k2)

    print("KERNEL_OK")
</pallas_src>

<mosaic_0001>
module attributes {stable_mosaic.version = 11 : i64} {
  func.func @_prep_kernel(%arg0: i32, %arg1: i32, %arg2: memref<16x16xf32, #tpu.memory_space<vmem>>, %arg3: memref<16x32xf32, #tpu.memory_space<vmem>>, %arg4: memref<32x128xf32, #tpu.memory_space<vmem>>, %arg5: memref<1x128xf32, #tpu.memory_space<vmem>>, %arg6: memref<16x128xf32, #tpu.memory_space<vmem>>, %arg7: memref<16x128xf32, #tpu.memory_space<vmem>>, %arg8: memref<16x1xf32, #tpu.memory_space<vmem>>, %arg9: memref<16x1xf32, #tpu.memory_space<vmem>>, %arg10: memref<16x1xf32, #tpu.memory_space<vmem>>) attributes {dimension_semantics = [#tpu.dimension_semantics<parallel>, #tpu.dimension_semantics<arbitrary>], iteration_bounds = array<i64: 1, 1>, scalar_prefetch = 0 : i64, scratch_operands = 2 : i64, tpu.core_type = #tpu.core_type<tc>, window_params = [{transform_indices = @transform_0, window_bounds = array<i64: 16, 16>}, {transform_indices = @transform_1, window_bounds = array<i64: 16, 32>}, {pipeline_mode = #tpu.pipeline_mode<synchronous>, transform_indices = @transform_2, window_bounds = array<i64: 32, 128>}, {pipeline_mode = #tpu.pipeline_mode<synchronous>, transform_indices = @transform_3, window_bounds = array<i64: 1, 128>}, {transform_indices = @transform_4, window_bounds = array<i64: 16, 128>}, {transform_indices = @transform_5, window_bounds = array<i64: 16, 128>}, {transform_indices = @transform_6, window_bounds = array<i64: 16, 1>}]} {
    %c0_i32 = arith.constant 0 : i32
    %0 = arith.cmpi eq, %arg1, %c0_i32 : i32
    %1 = arith.extui %0 : i1 to i32
    %c0_i32_0 = arith.constant 0 : i32
    %2 = arith.cmpi ne, %1, %c0_i32_0 : i32
    scf.if %2 {
      %cst_9 = arith.constant 0.000000e+00 : f32
      %15 = vector.broadcast %cst_9 : f32 to vector<16x1xf32>
      %c0_10 = arith.constant 0 : index
      %c0_11 = arith.constant 0 : index
      %16 = vector.load %arg9[%c0_10, %c0_11] : memref<16x1xf32, #tpu.memory_space<vmem>>, vector<16x1xf32>
      tpu.vector_store %arg9[%c0_10, %c0_11], %15 {strides = array<i32>} : memref<16x1xf32, #tpu.memory_space<vmem>>, vector<16x1xf32>,
      %cst_12 = arith.constant 0.000000e+00 : f32
      %17 = vector.broadcast %cst_12 : f32 to vector<16x1xf32>
      %c0_13 = arith.constant 0 : index
      %c0_14 = arith.constant 0 : index
      %18 = vector.load %arg10[%c0_13, %c0_14] : memref<16x1xf32, #tpu.memory_space<vmem>>, vector<16x1xf32>
      tpu.vector_store %arg10[%c0_13, %c0_14], %17 {strides = array<i32>} : memref<16x1xf32, #tpu.memory_space<vmem>>, vector<16x1xf32>,
    } else {
    }
    %c0 = arith.constant 0 : index
    %c0_1 = arith.constant 0 : index
    %3 = vector.load %arg2[%c0, %c0_1] : memref<16x16xf32, #tpu.memory_space<vmem>>, vector<16x16xf32>
    %c0_2 = arith.constant 0 : index
    %c0_3 = arith.constant 0 : index
    %4 = vector.load %arg9[%c0_2, %c0_3] : memref<16x1xf32, #tpu.memory_space<vmem>>, vector<16x1xf32>
    %cst = arith.constant dense<0.000000e+00> : vector<16xf32>
    %5 = vector.multi_reduction <add>, %3, %cst [1] : vector<16x16xf32> to vector<16xf32>
    %6 = vector.shape_cast %5 : vector<16xf32> to vector<16x1xf32>
    %7 = arith.addf %4, %6 : vector<16x1xf32>
    %c0_4 = arith.constant 0 : index
    %c0_5 = arith.constant 0 : index
    %8 = vector.load %arg9[%c0_4, %c0_5] : memref<16x1xf32, #tpu.memory_space<vmem>>, vector<16x1xf32>
    tpu.vector_store %arg9[%c0_4, %c0_5], %7 {strides = array<i32>} : memref<16x1xf32, #tpu.memory_space<vmem>>, vector<16x1xf32>,
    %9 = arith.cmpi eq, %arg1, %arg0 : i32
    %10 = arith.extui %9 : i1 to i32
    %c0_i32_6 = arith.constant 0 : i32
    %11 = arith.cmpi ne, %10, %c0_i32_6 : i32
    scf.if %11 {
      %15 = tpu.iota {dimensions = array<i32: 0>} : vector<16x16xi32>
      %16 = tpu.iota {dimensions = array<i32: 1>} : vector<16x16xi32>
      %17 = arith.cmpi eq, %15, %16 : vector<16x16xi32>
      %cst_9 = arith.constant 0.000000e+00 : f32
      %18 = vector.broadcast %cst_9 : f32 to vector<16x16xf32>
      %19 = arith.select %17, %3, %18 : vector<16x16xi1>, vector<16x16xf32>
      %cst_10 = arith.constant dense<0.000000e+00> : vector<16xf32>
      %20 = vector.multi_reduction <add>, %19, %cst_10 [1] : vector<16x16xf32> to vector<16xf32>
      %21 = vector.shape_cast %20 : vector<16xf32> to vector<16x1xf32>
      %c0_11 = arith.constant 0 : index
      %c0_12 = arith.constant 0 : index
      %22 = vector.load %arg10[%c0_11, %c0_12] : memref<16x1xf32, #tpu.memory_space<vmem>>, vector<16x1xf32>
      tpu.vector_store %arg10[%c0_11, %c0_12], %21 {strides = array<i32>} : memref<16x1xf32, #tpu.memory_space<vmem>>, vector<16x1xf32>,
    } else {
    }
    %c0_i32_7 = arith.constant 0 : i32
    %12 = arith.cmpi eq, %arg1, %c0_i32_7 : i32
    %13 = arith.extui %12 : i1 to i32
    %c0_i32_8 = arith.constant 0 : i32
    %14 = arith.cmpi ne, %13, %c0_i32_8 : i32
    scf.if %14 {
      %c0_9 = arith.constant 0 : index
      %c0_10 = arith.constant 0 : index
      %15 = vector.load %arg9[%c0_9, %c0_10] : memref<16x1xf32, #tpu.memory_space<vmem>>, vector<16x1xf32>
      %c0_11 = arith.constant 0 : index
      %c0_12 = arith.constant 0 : index
      %16 = vector.load %arg10[%c0_11, %c0_12] : memref<16x1xf32, #tpu.memory_space<vmem>>, vector<16x1xf32>
      %17 = arith.subf %15, %16 : vector<16x1xf32>
      %cst_13 = arith.constant 1.000000e+00 : f32
      %18 = vector.broadcast %cst_13 : f32 to vector<16x1xf32>
      %19 = arith.addf %17, %18 : vector<16x1xf32>
      %20 = math.rsqrt %19 : vector<16x1xf32>
      %c0_14 = arith.constant 0 : index
      %c0_15 = arith.constant 0 : index
      %21 = vector.load %arg3[%c0_14, %c0_15] : memref<16x32xf32, #tpu.memory_space<vmem>>, vector<16x32xf32>
      %c0_16 = arith.constant 0 : index
      %c0_17 = arith.constant 0 : index
      %22 = vector.load %arg4[%c0_16, %c0_17] : memref<32x128xf32, #tpu.memory_space<vmem>>, vector<32x128xf32>
      %cst_18 = arith.constant dense<0.000000e+00> : vector<16x128xf32>
      %23 = tpu.matmul %21, %22, %cst_18 {dimension_numbers = #tpu.dot_dimension_numbers<[1], [0], [0], [1], [0, 0, 1, 1], [], []>} : vector<16x32xf32>, vector<32x128xf32>, vector<16x128xf32> -> vector<16x128xf32>
      %c0_19 = arith.constant 0 : index
      %c0_20 = arith.constant 0 : index
      %24 = vector.load %arg5[%c0_19, %c0_20] : memref<1x128xf32, #tpu.memory_space<vmem>>, vector<1x128xf32>
      %25 = vector.broadcast %24 : vector<1x128xf32> to vector<16x128xf32>
      %26 = arith.addf %23, %25 : vector<16x128xf32>
      %27 = vector.broadcast %20 : vector<16x1xf32> to vector<16x128xf32>
      %28 = arith.mulf %27, %26 : vector<16x128xf32>
      %c0_21 = arith.constant 0 : index
      %c0_22 = arith.constant 0 : index
      %29 = vector.load %arg6[%c0_21, %c0_22] : memref<16x128xf32, #tpu.memory_space<vmem>>, vector<16x128xf32>
      tpu.vector_store %arg6[%c0_21, %c0_22], %28 {strides = array<i32>} : memref<16x128xf32, #tpu.memory_space<vmem>>, vector<16x128xf32>,
      %c0_23 = arith.constant 0 : index
      %c0_24 = arith.constant 0 : index
      %30 = vector.load %arg10[%c0_23, %c0_24] : memref<16x1xf32, #tpu.memory_space<vmem>>, vector<16x1xf32>
      %cst_25 = arith.constant 1.000000e+00 : f32
      %31 = vector.broadcast %cst_25 : f32 to vector<16x1xf32>
      %32 = arith.subf %31, %30 : vector<16x1xf32>
      %33 = arith.mulf %20, %32 : vector<16x1xf32>
      %34 = vector.broadcast %33 : vector<16x1xf32> to vector<16x128xf32>
      %35 = arith.mulf %34, %28 : vector<16x128xf32>
      %c0_26 = arith.constant 0 : index
      %c0_27 = arith.constant 0 : index
      %36 = vector.load %arg7[%c0_26, %c0_27] : memref<16x128xf32, #tpu.memory_space<vmem>>, vector<16x128xf32>
      tpu.vector_store %arg7[%c0_26, %c0_27], %35 {strides = array<i32>} : memref<16x128xf32, #tpu.memory_space<vmem>>, vector<16x128xf32>,
      %c0_28 = arith.constant 0 : index
      %c0_29 = arith.constant 0 : index
      %37 = vector.load %arg8[%c0_28, %c0_29] : memref<16x1xf32, #tpu.memory_space<vmem>>, vector<16x1xf32>
      tpu.vector_store %arg8[%c0_28, %c0_29], %20 {strides = array<i32>} : memref<16x1xf32, #tpu.memory_space<vmem>>, vector<16x1xf32>,
    } else {
    }
    return
  }
  func.func @transform_0(%arg0: i32, %arg1: i32) -> (i32, i32) {
    %c0_i32 = arith.constant 0 : i32
    return %arg0, %arg1 : i32, i32
  }
  func.func @transform_1(%arg0: i32, %arg1: i32) -> (i32, i32) {
    %c0_i32 = arith.constant 0 : i32
    %c0_i32_0 = arith.constant 0 : i32
    return %arg0, %c0_i32 : i32, i32
  }
  func.func @transform_2(%arg0: i32, %arg1: i32) -> (i32, i32) {
    %c0_i32 = arith.constant 0 : i32
    %c0_i32_0 = arith.constant 0 : i32
    %c0_i32_1 = arith.constant 0 : i32
    return %c0_i32, %c0_i32_0 : i32, i32
  }
  func.func @transform_3(%arg0: i32, %arg1: i32) -> (i32, i32) {
    %c0_i32 = arith.constant 0 : i32
    %c0_i32_0 = arith.constant 0 : i32
    %c0_i32_1 = arith.constant 0 : i32
    return %c0_i32, %c0_i32_0 : i32, i32
  }
  func.func @transform_4(%arg0: i32, %arg1: i32) -> (i32, i32) {
    %c0_i32 = arith.constant 0 : i32
    %c0_i32_0 = arith.constant 0 : i32
    return %arg0, %c0_i32 : i32, i32
  }
  func.func @transform_5(%arg0: i32, %arg1: i32) -> (i32, i32) {
    %c0_i32 = arith.constant 0 : i32
    %c0_i32_0 = arith.constant 0 : i32
    return %arg0, %c0_i32 : i32, i32
  }
  func.func @transform_6(%arg0: i32, %arg1: i32) -> (i32, i32) {
    %c0_i32 = arith.constant 0 : i32
    %c0_i32_0 = arith.constant 0 : i32
    return %arg0, %c0_i32 : i32, i32
  }
}

</mosaic_0001>

<bundles_post_ra>
// kernel: tpu_custom_call.1
= control target key start
LH: loop header
LB: loop body
LE: loop exit
PB: predicated region body
PF: predicated region fallthrough
CT: control target
= control target key end

     0   :  { %12 = vsyncpa [#allocation5], 0  ;;  %s533_s0 = inlined_call_operand.hbm [shape: f32[16,16], index: 0, kind: input, shape index: {}]   ;;  %s534_s1 = inlined_call_operand.hbm [shape: f32[16,32], index: 1, kind: input, shape index: {}]   ;;  %s535_s2 = inlined_call_operand.hbm [shape: f32[32,128], index: 2, kind: input, shape index: {}]   ;;  %s536_s3 = inlined_call_operand.vmem [shape: f32[1,128], index: 3, kind: input, shape index: {}]   ;;  %s537_s4 = inlined_call_operand.hbm [shape: f32[16,128], index: 4, kind: output, shape index: {0}]   ;;  %s538_s5 = inlined_call_operand.hbm [shape: f32[16,128], index: 5, kind: output, shape index: {1}]   ;;  %s539_s6 = inlined_call_operand.vmem [shape: f32[16,1], index: 6, kind: output, shape index: {2}]  }
   0x1   :  { %13 = vsyncpa [#allocation8], 0 }
   0x2   :  { %14 = vsyncpa [#allocation6], 0 }
   0x3   :  { %15 = vsyncpa [#allocation12], 0  ;;  %s434_s21 = smov [#allocation7]   ;;  %s435_s23 = smov [#allocation4]  }
   0x4   :  { %s33_s22 = sshll.u32 %s434_s21, 4  ;;  %s21_s24 = sshll.u32 %s435_s23, 4  ;;  %s34_s22 = int_to_ptr.vmem [resolvable:$true] %s33_s22  ;;  %s22_s24 = int_to_ptr.vmem [resolvable:$true] %s21_s24 }
   0x5   :  { %s334_s25 = scalar_lea.vmem %s34_s22, 256  ;;  %p339_p1 = scmp.lt.s32.totalorder %s34_s22, %s34_s22 }
   0x6   :  { %p335_p0 = scmp.ne.s32.totalorder %s34_s22, %s334_s25  ;;  %p340_p2 = scmp.lt.s32.totalorder %s334_s25, %s334_s25 }
   0x8   :  { %p341_p3 = por %p340_p2, %p339_p1 }
   0xa   :  { %p342_p4 = pnand %p341_p3, %p335_p0 }
   0xc   :  { %345 = shalt.err (!%p342_p4)
}
   0xd   :  { %s436_s26 = smov 128   ;;  %s437_s27 = smov 8  }
   0xe   :  { %39 = dma.hbm_to_vmem [thread:$0]  %s534_s1, 256, %s34_s22, [#allocation8], %s436_s26, %s436_s26, %s437_s27  }
   0xf   :  { %s354_s30 = scalar_lea.vmem %s22_s24, 256  ;;  %p359_p6 = scmp.lt.s32.totalorder %s22_s24, %s22_s24 }
  0x10   :  { %p355_p5 = scmp.ne.s32.totalorder %s22_s24, %s354_s30  ;;  %p360_p7 = scmp.lt.s32.totalorder %s354_s30, %s354_s30 }
  0x12   :  { %p361_p8 = por %p360_p7, %p359_p6 }
  0x14   :  { %p362_p9 = pnand %p361_p8, %p355_p5 }
  0x16   :  { %365 = shalt.err (!%p362_p9)
}
  0x17   :  { %27 = dma.hbm_to_vmem [thread:$0]  %s533_s0, 256, %s22_s24, [#allocation5], %s436_s26, %s436_s26, %s437_s27  }
  0x18   :  { %s438_s9 = smov [#allocation9]  }
  0x19   :  { %s45_s10 = sshll.u32 %s438_s9, 4  ;;  %s46_s10 = int_to_ptr.vmem [resolvable:$true] %s45_s10 }
  0x1a   :  { %s374_s11 = scalar_lea.vmem %s46_s10, 512  ;;  %p379_p11 = scmp.lt.s32.totalorder %s46_s10, %s46_s10 }
  0x1b   :  { %p375_p10 = scmp.ne.s32.totalorder %s46_s10, %s374_s11  ;;  %p380_p12 = scmp.lt.s32.totalorder %s374_s11, %s374_s11 }
  0x1d   :  { %p381_p13 = por %p380_p12, %p379_p11 }
  0x1f   :  { %p382_p0 = pnand %p381_p13, %p375_p10 }
  0x21   :  { %385 = shalt.err (!%p382_p0)
}
  0x22   :  { %51 = dma.hbm_to_vmem [thread:$0]  %s535_s2, 512, %s46_s10, [#allocation8], %s436_s26, %s436_s26, %s437_s27  }
  0x23   :  { %426 = dma.done.wait [#allocation5], 256  }
  0x24   :  { %427 = vsyncadd [#allocation5], 4294967040 }
  0x25   :  { %428 = dma.done.wait [#allocation8], 768  }
  0x26   :  { %429 = vsyncadd [#allocation8], 4294966528  ;;  %v92_v0 = vlaneseq  ;;  %vm67_vm0 = vcmask 7168   ;;  %v439_v3 = vmov 0.0   ;;  %vm76_vm1 = vcmask 130048   ;;  %v72_v5 = vld [vmem:[#allocation4] sm:$0xff] }
  0x27   :  { %68 = vst.msk [vmem:[#allocation2] sm:$0xff] %vm67_vm0, %v439_v3  ;;  %69 = vst.msk [vmem:[#allocation2 + $0x8] sm:$0xff] %vm67_vm0, %v439_v3  ;;  %v73_v6 = vld [vmem:[#allocation4 + $0x8] sm:$0xff]  ;;  %v127_v7 = vld [vmem:[#allocation9 + $0x18] sm:$0xff]  ;;  %v77_v8 = vsel %vm76_vm1, %v72_v5, 0.0  ;;  %vm135_vm4 = vcmask 261120  }
  0x28   :  { %v93_v1 = vshrl.u32 %v92_v0, 7  ;;  %v96_v2 = vand.u32 127, %v92_v0  ;;  %70 = vst.msk [vmem:[#allocation3] sm:$0xff] %vm67_vm0, %v439_v3  ;;  %71 = vst.msk [vmem:[#allocation3 + $0x8] sm:$0xff] %vm67_vm0, %v439_v3  ;;  %300 = vmatprep.subr.mxu0 %v127_v7  ;;  %v126_v11 = vld [vmem:[#allocation9 + $0x10] sm:$0xff]  ;;  %78 = vadd.xlane.f32.xlu0 %v77_v8  ;;  %v125_v13 = vld [vmem:[#allocation9 + $0x8] sm:$0xff] }
  0x29   :  { %301 = vmatpush3.msra.mxu0 %v127_v7  ;;  %v122_v14 = vld [vmem:[#allocation7] sm:$0xff]  ;;  %v80_v15 = vsel %vm76_vm1, %v73_v6, 0.0  ;;  %v124_v17 = vld [vmem:[#allocation9] sm:$0xff]  ;;  %v123_v18 = vld [vmem:[#allocation7 + $0x8] sm:$0xff]  ;;  %v440_v19 = vmov 0   ;;  %s441_s17 = smov [#allocation10]  }
  0x2a   :  { %v94_v4 = vadd.s32 8, %v93_v1  ;;  %vm97_vm2 = vcmp.eq.s32.totalorder %v93_v1, %v96_v2  ;;  %302 = vmatprep.subr.mxu0 %v126_v11  ;;  %308 = vmatprep.mubr.msk.f32.mxu0 %vm135_vm4, %v122_v14  ;;  %v291_v43 = vld [vmem:[%s536_s3] ss:$0 sm:$0xff]  ;;  %s258_s18 = sshll.u32 %s441_s17, 4  ;;  %s259_s18 = int_to_ptr.vmem [resolvable:$true] %s258_s18 }
  0x2b   :  { %v99_v9 = vsel %vm97_vm2, %v72_v5, 0.0  ;;  %303 = vmatpush3.msra.mxu0 %v126_v11  ;;  %320 = vset.pattern.permute.xlu0 %v440_v19  ;;  %p391_p2 = scmp.lt.s32.totalorder %s259_s18, %s259_s18 }
  0x2c   :  { %vm98_vm3 = vcmp.eq.s32.totalorder %v94_v4, %v96_v2  ;;  %v101_v12 = vsel %vm76_vm1, %v99_v9, 0.0  ;;  %304 = vmatprep.subr.mxu0 %v125_v13  ;;  %81 = vadd.xlane.f32.xlu0 %v80_v15 }
  0x2d   :  { %v100_v10 = vsel %vm98_vm3, %v73_v6, 0.0  ;;  %102 = vadd.xlane.f32.xlu1 %v101_v12  ;;  %305 = vmatpush3.msra.mxu0 %v125_v13 }
  0x2e   :  { %v104_v16 = vsel %vm76_vm1, %v100_v10, 0.0  ;;  %306 = vmatprep.subr.mxu0 %v124_v17  ;;  %321 = vset.pattern.permute.xlu1 %v440_v19  ;;  %v74_v20 = vld [vmem:[#allocation2] sm:$0xff]  ;;  %v75_v24 = vld [vmem:[#allocation2 + $0x8] sm:$0xff] }
  0x2f   :  { %307 = vmatpush3.msra.mxu0 %v124_v17 }
  0x30   :  { %309 = vmatmul.mubr.msk.f32.vlgmr.msra.gmra.mxu0 %vm135_vm4, %v123_v18 }
  0x31   :  { %105 = vadd.xlane.f32.xlu1 %v104_v16 }
  0xb1   :  { %v79_v21 = vpop.xlane.xlu0 %78 }
  0xb2   :  { %v83_v22 = vadd.f32 %v79_v21, %v74_v20 }
  0xb4   :  { %86 = vst.msk [vmem:[#allocation2] sm:$0xff] %vm67_vm0, %v83_v22 }
  0xb5   :  { %v82_v25 = vpop.xlane.xlu0 %81 }
  0xb6   :  { %v103_v23 = vpop.xlane.xlu1 %102  ;;  %v84_v26 = vadd.f32 %v82_v25, %v75_v24 }
  0xb7   :  { %107 = vst.msk [vmem:[#allocation3] sm:$0xff] %vm67_vm0, %v103_v23 }
  0xb8   :  { %87 = vst.msk [vmem:[#allocation2 + $0x8] sm:$0xff] %vm67_vm0, %v84_v26 }
  0xba   :  { %v106_v27 = vpop.xlane.xlu1 %105 }
  0xbb   :  { %108 = vst.msk [vmem:[#allocation3 + $0x8] sm:$0xff] %vm67_vm0, %v106_v27  ;;  %v112_v29 = vld [vmem:[#allocation2] sm:$0xff] }
  0xbe   :  { %v114_v28 = vld [vmem:[#allocation3] sm:$0xff] }
  0xbf   :  { %v116_v30 = vsub.f32 %v112_v29, %v114_v28  ;;  %v113_v33 = vld [vmem:[#allocation2 + $0x8] sm:$0xff]  ;;  %v233_v38 = vsub.f32 1.0, %v114_v28 }
  0xc1   :  { %v118_v31 = vadd.f32 1.0, %v116_v30 }
  0xc2   :  { %v115_v32 = vld [vmem:[#allocation3 + $0x8] sm:$0xff] }
  0xc3   :  { %322 = vrsqrt.f32 %v118_v31  ;;  %v117_v34 = vsub.f32 %v113_v33, %v115_v32  ;;  %v234_v40 = vsub.f32 1.0, %v115_v32 }
  0xc5   :  { %v119_v35 = vadd.f32 1.0, %v117_v34 }
  0xc7   :  { %324 = vrsqrt.f32 %v119_v35 }
  0xd0   :  { %v323_v36 = vpop.eup %322 }
  0xd1   :  { %219 = vperm.xlu0 %320, %v323_v36   ;;  %251 = vst.msk [vmem:[%s539_s6] sm:$0xff] %vm67_vm0, %v323_v36  ;;  %v235_v39 = vmul.f32 %v323_v36, %v233_v38 }
  0xd4   :  { %v325_v37 = vpop.eup %324 }
  0xd5   :  { %224 = vperm.xlu1 %321, %v325_v37   ;;  %252 = vst.msk [vmem:[%s539_s6 + $0x8] sm:$0xff] %vm67_vm0, %v325_v37  ;;  %v236_v41 = vmul.f32 %v325_v37, %v234_v40  ;;  %s386_s6 = scalar_lea.vmem %s259_s18, 256 }
  0xd6   :  { %p387_p1 = scmp.ne.s32.totalorder %s259_s18, %s386_s6  ;;  %p392_p3 = scmp.lt.s32.totalorder %s386_s6, %s386_s6 }
  0xd8   :  { %p393_p4 = por %p392_p3, %p391_p2 }
  0xd9   :  { %239 = vperm.xlu1 %321, %v235_v39  }
  0xda   :  { %p394_p5 = pnand %p393_p4, %p387_p1 }
  0xdd   :  { %244 = vperm.xlu1 %321, %v236_v41  }
  0xf0   :  { %v310_v42 = vpop.f32.mrf.mxu0 }
  0xf1   :  { %v214_v47 = vadd.f32 %v310_v42, %v291_v43 }
  0xf2   :  { %v208_v44 = vpop.f32.mrf.mxu0 }
  0xf3   :  { %v209_v45 = vadd.f32 %v291_v43, %v208_v44 }
 0x14c   :  { %v220_v46 = vpop.permute.xlu0 %219 }
 0x14d   :  { %v227_v48 = vmul.f32 %v220_v46, %v209_v45 }
 0x14f   :  { %229 = vst [vmem:[#allocation10] sm:$0xff] %v227_v48 }
 0x150   :  { %v225_v49 = vpop.permute.xlu1 %224 }
 0x151   :  { %v228_v50 = vmul.f32 %v225_v49, %v214_v47 }
 0x153   :  { %230 = vst [vmem:[#allocation10 + $0x8] sm:$0xff] %v228_v50 }
 0x154   :  { %v240_v51 = vpop.permute.xlu1 %239 }
 0x155   :  { %397 = shalt.err (!%p394_p5)
}
 0x156   :  { %264 = dma.vmem_to_hbm [thread:$0]  %s259_s18, 256, %s537_s4, [#allocation6], %s436_s26, %s436_s26, %s437_s27   ;;  %v247_v52 = vmul.f32 %v240_v51, %v227_v48 }
 0x157   :  { %s442_s20 = smov [#allocation11]  }
 0x158   :  { %s270_s21 = sshll.u32 %s442_s20, 4  ;;  %249 = vst [vmem:[#allocation11] sm:$0xff] %v247_v52  ;;  %v245_v53 = vpop.permute.xlu1 %244  ;;  %s271_s21 = int_to_ptr.vmem [resolvable:$true] %s270_s21 }
 0x159   :  { %v248_v54 = vmul.f32 %v245_v53, %v228_v50  ;;  %s406_s22 = scalar_lea.vmem %s271_s21, 256  ;;  %p411_p7 = scmp.lt.s32.totalorder %s271_s21, %s271_s21 }
 0x15a   :  { %p407_p6 = scmp.ne.s32.totalorder %s271_s21, %s406_s22  ;;  %p412_p8 = scmp.lt.s32.totalorder %s406_s22, %s406_s22 }
 0x15b   :  { %250 = vst [vmem:[#allocation11 + $0x8] sm:$0xff] %v248_v54 }
 0x15c   :  { %p413_p9 = por %p412_p8, %p411_p7 }
 0x15e   :  { %p414_p10 = pnand %p413_p9, %p407_p6 }
 0x160   :  { %417 = shalt.err (!%p414_p10)
}
 0x161   :  { %276 = dma.vmem_to_hbm [thread:$0]  %s271_s21, 256, %s538_s5, [#allocation12], %s436_s26, %s436_s26, %s437_s27  }
 0x162   :  { %430 = dma.done.wait [#allocation6], 256  }
 0x163   :  { %431 = vsyncadd [#allocation6], 4294967040 }
 0x164   :  { %432 = dma.done.wait [#allocation12], 256  }
 0x165   :  { %433 = vsyncadd [#allocation12], 4294967040 }
 0x166   :  { %287 = vsyncpa [#allocation5], 1 }
 0x167   :  { %288 = vsyncpa [#allocation8], 1 }
 0x168   :  { %289 = vsyncpa [#allocation6], 1 }
 0x169   :  { %290 = vsyncpa [#allocation12], 1 }

</bundles_post_ra>
